<compile_context>
chip_gen: v6e
topology: v6e:2x2x1
jax: 0.10.0
libtpu: 0.0.40
codegen_flags: <defaults>
</compile_context>

<pallas_src>
import jax
import jax.numpy as jnp
from jax.experimental import pallas as pl
from jax.experimental.pallas import tpu as pltpu


def _round_up(x: int, m: int) -> int:
    return (x + m - 1) // m * m


def _ipd_kernel_single_k(xr_ref, xc_ref, o_ref):
    """gk == 1: one (tm, tn) output tile = sigmoid(x_rows @ x_cols.T)."""
    g = jax.lax.dot_general(
        xr_ref[...], xc_ref[...],
        dimension_numbers=(((1,), (1,)), ((), ())),
        preferred_element_type=jnp.float32,
    )
    o_ref[...] = jax.nn.sigmoid(g).astype(o_ref.dtype)


def _ipd_kernel_multi_k(xr_ref, xc_ref, o_ref, acc_ref):
    """gk > 1: f32 accumulator over k tiles, sigmoid on the last k step."""
    @pl.when(pl.program_id(2) == 0)
    def _():
        acc_ref[...] = jnp.zeros_like(acc_ref)

    acc_ref[...] += jax.lax.dot_general(
        xr_ref[...], xc_ref[...],
        dimension_numbers=(((1,), (1,)), ((), ())),
        preferred_element_type=jnp.float32,
    )

    @pl.when(pl.program_id(2) == pl.num_programs(2) - 1)
    def _():
        o_ref[...] = jax.nn.sigmoid(acc_ref[...]).astype(o_ref.dtype)


def inner_product_decoder(x, dropout: float = 0.0, *, block_n: int = 512,
                          block_k: int = 512,
                          operand_dtype=jnp.float32,
                          out_dtype=jnp.float32):
    """x: (N, D) array. Returns flattened sigmoid(x @ x.T) of shape (N*N,).

    operand_dtype=jnp.bfloat16 feeds the MXU at native rate (looser accuracy);
    out_dtype=jnp.bfloat16 halves the N^2 writeback. Defaults keep full f32.
    """
    # dropout == 0.0 -> identity (matches nn.Dropout(p=0.0) / eval mode).
    assert dropout == 0.0
    n, d = x.shape

    # Pad N only to the lane width (128); then pick the largest lane-dense
    # tile that divides n_pad (so no extra padding is induced by the tile).
    n_pad = _round_up(n, 128)
    tn = 128
    for cand in (512, 384, 256, 128):
        if cand <= block_n and n_pad % cand == 0:
            tn = cand
            break
    tm = tn

    # Contraction tiling: only tile / pad K when the hidden dim is large.
    if d <= block_k:
        tk, d_pad = d, d
    else:
        tk = block_k
        d_pad = _round_up(d, tk)

    xp = x.astype(operand_dtype)
    if (n_pad, d_pad) != (n, d):
        # Zero padding does not change the Gram matrix of the real rows.
        xp = jnp.pad(xp, ((0, n_pad - n), (0, d_pad - d)))

    gm, gn, gk = n_pad // tm, n_pad // tn, d_pad // tk

    op_bytes = jnp.dtype(operand_dtype).itemsize
    out_bytes = jnp.dtype(out_dtype).itemsize
    cost = pl.CostEstimate(
        flops=2 * n_pad * n_pad * d_pad,
        transcendentals=n_pad * n_pad,                            # sigmoid exp
        # Row tiles re-read gn times, col tiles re-read gm times, plus output.
        bytes_accessed=n_pad * d_pad * op_bytes * (gm + gn)
                       + n_pad * n_pad * out_bytes,
    )

    if gk == 1:
        out = pl.pallas_call(
            _ipd_kernel_single_k,
            out_shape=jax.ShapeDtypeStruct((n_pad, n_pad), out_dtype),
            grid=(gm, gn),
            in_specs=[
                pl.BlockSpec((tm, d_pad), lambda i, j: (i, 0)),   # row tile
                pl.BlockSpec((tn, d_pad), lambda i, j: (j, 0)),   # col tile
            ],
            out_specs=pl.BlockSpec((tm, tn), lambda i, j: (i, j)),
            compiler_params=pltpu.CompilerParams(
                dimension_semantics=("parallel", "parallel"),
            ),
            cost_estimate=cost,
        )(xp, xp)
    else:
        out = pl.pallas_call(
            _ipd_kernel_multi_k,
            out_shape=jax.ShapeDtypeStruct((n_pad, n_pad), out_dtype),
            grid=(gm, gn, gk),
            in_specs=[
                pl.BlockSpec((tm, tk), lambda i, j, k: (i, k)),   # row tile
                pl.BlockSpec((tn, tk), lambda i, j, k: (j, k)),   # col tile
            ],
            out_specs=pl.BlockSpec((tm, tn), lambda i, j, k: (i, j)),
            scratch_shapes=[pltpu.VMEM((tm, tn), jnp.float32)],
            compiler_params=pltpu.CompilerParams(
                dimension_semantics=("parallel", "parallel", "arbitrary"),
            ),
            cost_estimate=cost,
        )(xp, xp)

    if n_pad != n:
        out = out[:n, :n]
    return out.reshape(-1)


if __name__ == "__main__":
    key = jax.random.PRNGKey(0)

    # Shapes implied by the module: seq (nodes) = 8, hidden = 32.
    N, D = 8, 32
    x = jax.random.normal(key, (N, D), dtype=jnp.float32)
    y = jax.block_until_ready(inner_product_decoder(x))
    ref = jax.nn.sigmoid(x @ x.T).reshape(-1)
    assert y.shape == (N * N,)
    assert jnp.allclose(y, ref, atol=1e-5, rtol=1e-5)

    # Multi-tile output grid + row padding (N=300 -> n_pad=384, 3x3 tiles of 128).
    N2, D2 = 300, 96
    x2 = jax.random.normal(jax.random.PRNGKey(1), (N2, D2), dtype=jnp.float32)
    y2 = jax.block_until_ready(inner_product_decoder(x2, block_n=128))
    ref2 = jax.nn.sigmoid(x2 @ x2.T).reshape(-1)
    assert y2.shape == (N2 * N2,)
    assert jnp.allclose(y2, ref2, atol=1e-4, rtol=1e-4)

    # Large hidden dim exercises the multi-k accumulator path (gk = 2).
    N3, D3 = 256, 1024
    x3 = jax.random.normal(jax.random.PRNGKey(2), (N3, D3), dtype=jnp.float32)
    y3 = jax.block_until_ready(inner_product_decoder(x3, block_k=512))
    ref3 = jax.nn.sigmoid(x3 @ x3.T).reshape(-1)
    assert y3.shape == (N3 * N3,)
    assert jnp.allclose(y3, ref3, atol=1e-4, rtol=1e-4)

    # bf16 operand / output fast path (looser tolerance, gated behind flags).
    y4 = jax.block_until_ready(
        inner_product_decoder(x2, block_n=128,
                              operand_dtype=jnp.bfloat16,
                              out_dtype=jnp.bfloat16))
    assert y4.shape == (N2 * N2,)
    assert jnp.allclose(y4.astype(jnp.float32), ref2, atol=2e-2, rtol=2e-2)

    print("KERNEL_OK")
</pallas_src>

<mosaic_0001>
module attributes {stable_mosaic.version = 11 : i64} {
  func.func @_ipd_kernel_single_k(%arg0: i32, %arg1: i32, %arg2: memref<128x32xf32, #tpu.memory_space<vmem>>, %arg3: memref<128x32xf32, #tpu.memory_space<vmem>>, %arg4: memref<128x128xf32, #tpu.memory_space<vmem>>) attributes {dimension_semantics = [#tpu.dimension_semantics<parallel>, #tpu.dimension_semantics<parallel>], iteration_bounds = array<i64: 1, 1>, scalar_prefetch = 0 : i64, scratch_operands = 0 : i64, tpu.core_type = #tpu.core_type<tc>, window_params = [{transform_indices = @transform_0, window_bounds = array<i64: 128, 32>}, {transform_indices = @transform_1, window_bounds = array<i64: 128, 32>}, {transform_indices = @transform_2, window_bounds = array<i64: 128, 128>}]} {
    %c0 = arith.constant 0 : index
    %c0_0 = arith.constant 0 : index
    %0 = vector.load %arg2[%c0, %c0_0] : memref<128x32xf32, #tpu.memory_space<vmem>>, vector<128x32xf32>
    %c0_1 = arith.constant 0 : index
    %c0_2 = arith.constant 0 : index
    %1 = vector.load %arg3[%c0_1, %c0_2] : memref<128x32xf32, #tpu.memory_space<vmem>>, vector<128x32xf32>
    %cst = arith.constant dense<0.000000e+00> : vector<128x128xf32>
    %2 = tpu.matmul %0, %1, %cst {dimension_numbers = #tpu.dot_dimension_numbers<[1], [1], [0], [0], [0, 0, 1, 0], [], []>} : vector<128x32xf32>, vector<128x32xf32>, vector<128x128xf32> -> vector<128x128xf32>
    %3 = arith.negf %2 : vector<128x128xf32>
    %4 = math.exp %3 : vector<128x128xf32>
    %cst_3 = arith.constant 1.000000e+00 : f32
    %5 = vector.broadcast %cst_3 : f32 to vector<128x128xf32>
    %6 = arith.addf %5, %4 : vector<128x128xf32>
    %7 = arith.divf %5, %6 : vector<128x128xf32>
    %c0_4 = arith.constant 0 : index
    %c0_5 = arith.constant 0 : index
    %8 = vector.load %arg4[%c0_4, %c0_5] : memref<128x128xf32, #tpu.memory_space<vmem>>, vector<128x128xf32>
    tpu.vector_store %arg4[%c0_4, %c0_5], %7 {strides = array<i32>} : memref<128x128xf32, #tpu.memory_space<vmem>>, vector<128x128xf32>,
    return
  }
  func.func @transform_0(%arg0: i32, %arg1: i32) -> (i32, i32) {
    %c0_i32 = arith.constant 0 : i32
    %c0_i32_0 = arith.constant 0 : i32
    return %arg0, %c0_i32 : i32, i32
  }
  func.func @transform_1(%arg0: i32, %arg1: i32) -> (i32, i32) {
    %c0_i32 = arith.constant 0 : i32
    %c0_i32_0 = arith.constant 0 : i32
    return %arg1, %c0_i32 : i32, i32
  }
  func.func @transform_2(%arg0: i32, %arg1: i32) -> (i32, i32) {
    %c0_i32 = arith.constant 0 : i32
    return %arg0, %arg1 : i32, i32
  }
}

</mosaic_0001>

<bundles_post_ra>
// kernel: tpu_custom_call.1
= control target key start
LH: loop header
LB: loop body
LE: loop exit
PB: predicated region body
PF: predicated region fallthrough
CT: control target
= control target key end

     0   :  { %vm44_vm0 = vcmask 261120   ;;  %s868_s0 = inlined_call_operand.vmem [shape: f32[128,32], index: 0, kind: input, shape index: {}]   ;;  %s869_s1 = inlined_call_operand.vmem [shape: f32[128,32], index: 1, kind: input, shape index: {}]   ;;  %s870_s2 = inlined_call_operand.hbm [shape: f32[128,128], index: 2, kind: output, shape index: {}]  }
   0x1   :  { %v43_v0 = vld [vmem:[%s869_s1 + $0x78] sm:$0xff]  ;;  %v42_v1 = vld [vmem:[%s869_s1 + $0x70] sm:$0xff]  ;;  %v41_v2 = vld [vmem:[%s869_s1 + $0x68] sm:$0xff] }
   0x2   :  { %494 = vmatprep.subr.msk.mxu0 %vm44_vm0, %v43_v0  ;;  %550 = vmatprep.subr.msk.mxu1 %vm44_vm0, %v43_v0  ;;  %v12_v3 = vld [vmem:[%s868_s0] sm:$0xff] }
   0x3   :  { %495 = vmatpush3.xpose.msk.msra.mxu0 %vm44_vm0, %v43_v0  ;;  %566 = vmatpush3.xpose.msk.msra.mxu1 %vm44_vm0, %v43_v0  ;;  %v20_v4 = vld [vmem:[%s868_s0 + $0x40] sm:$0xff] }
   0x4   :  { %496 = vmatprep.subr.msk.mxu0 %vm44_vm0, %v42_v1  ;;  %551 = vmatprep.subr.msk.mxu1 %vm44_vm0, %v42_v1  ;;  %v40_v5 = vld [vmem:[%s869_s1 + $0x60] sm:$0xff] }
   0x5   :  { %526 = vmatprep.mubr.msk.f32.mxu0 %vm44_vm0, %v12_v3  ;;  %538 = vmatprep.mubr.msk.f32.mxu1 %vm44_vm0, %v20_v4 }
   0x7   :  { %497 = vmatpush3.xpose.msk.msra.mxu0 %vm44_vm0, %v42_v1  ;;  %567 = vmatpush3.xpose.msk.msra.mxu1 %vm44_vm0, %v42_v1 }
   0x8   :  { %498 = vmatprep.subr.msk.mxu0 %vm44_vm0, %v41_v2  ;;  %552 = vmatprep.subr.msk.mxu1 %vm44_vm0, %v41_v2 }
   0xb   :  { %499 = vmatpush3.xpose.msk.msra.mxu0 %vm44_vm0, %v41_v2  ;;  %568 = vmatpush3.xpose.msk.msra.mxu1 %vm44_vm0, %v41_v2 }
   0xc   :  { %7 = vsyncpa [#allocation3], 0  ;;  %500 = vmatprep.subr.msk.mxu0 %vm44_vm0, %v40_v5  ;;  %553 = vmatprep.subr.msk.mxu1 %vm44_vm0, %v40_v5  ;;  %v39_v6 = vld [vmem:[%s869_s1 + $0x58] sm:$0xff]  ;;  %v38_v7 = vld [vmem:[%s869_s1 + $0x50] sm:$0xff] }
   0xd   :  { %v37_v8 = vld [vmem:[%s869_s1 + $0x48] sm:$0xff]  ;;  %v36_v9 = vld [vmem:[%s869_s1 + $0x40] sm:$0xff]  ;;  %v35_v10 = vld [vmem:[%s869_s1 + $0x38] sm:$0xff] }
   0xe   :  { %v34_v11 = vld [vmem:[%s869_s1 + $0x30] sm:$0xff]  ;;  %v33_v12 = vld [vmem:[%s869_s1 + $0x28] sm:$0xff]  ;;  %v32_v13 = vld [vmem:[%s869_s1 + $0x20] sm:$0xff] }
   0xf   :  { %501 = vmatpush3.xpose.msk.msra.mxu0 %vm44_vm0, %v40_v5  ;;  %569 = vmatpush3.xpose.msk.msra.mxu1 %vm44_vm0, %v40_v5  ;;  %v31_v14 = vld [vmem:[%s869_s1 + $0x18] sm:$0xff]  ;;  %v30_v15 = vld [vmem:[%s869_s1 + $0x10] sm:$0xff]  ;;  %v29_v16 = vld [vmem:[%s869_s1 + $0x8] sm:$0xff] }
  0x10   :  { %502 = vmatprep.subr.msk.mxu0 %vm44_vm0, %v39_v6  ;;  %554 = vmatprep.subr.msk.mxu1 %vm44_vm0, %v39_v6  ;;  %v28_v17 = vld [vmem:[%s869_s1] sm:$0xff]  ;;  %v13_v18 = vld [vmem:[%s868_s0 + $0x8] sm:$0xff]  ;;  %v14_v20 = vld [vmem:[%s868_s0 + $0x10] sm:$0xff] }
  0x11   :  { %v21_v19 = vld [vmem:[%s868_s0 + $0x48] sm:$0xff]  ;;  %v22_v21 = vld [vmem:[%s868_s0 + $0x50] sm:$0xff]  ;;  %v15_v22 = vld [vmem:[%s868_s0 + $0x18] sm:$0xff] }
  0x12   :  { %v23_v23 = vld [vmem:[%s868_s0 + $0x58] sm:$0xff]  ;;  %v16_v24 = vld [vmem:[%s868_s0 + $0x20] sm:$0xff]  ;;  %v17_v26 = vld [vmem:[%s868_s0 + $0x28] sm:$0xff] }
  0x13   :  { %503 = vmatpush3.xpose.msk.msra.mxu0 %vm44_vm0, %v39_v6  ;;  %570 = vmatpush3.xpose.msk.msra.mxu1 %vm44_vm0, %v39_v6  ;;  %v24_v25 = vld [vmem:[%s868_s0 + $0x60] sm:$0xff]  ;;  %v25_v27 = vld [vmem:[%s868_s0 + $0x68] sm:$0xff]  ;;  %v18_v28 = vld [vmem:[%s868_s0 + $0x30] sm:$0xff] }
  0x14   :  { %504 = vmatprep.subr.msk.mxu0 %vm44_vm0, %v38_v7  ;;  %555 = vmatprep.subr.msk.mxu1 %vm44_vm0, %v38_v7  ;;  %v26_v29 = vld [vmem:[%s868_s0 + $0x70] sm:$0xff]  ;;  %v19_v30 = vld [vmem:[%s868_s0 + $0x38] sm:$0xff] }
  0x15   :  { %v27_v31 = vld [vmem:[%s868_s0 + $0x78] sm:$0xff]  ;;  %s671_s0 = smov [#allocation2]  }
  0x16   :  { %s403_s16 = sshll.u32 %s671_s0, 4  ;;  %s404_s16 = int_to_ptr.vmem [resolvable:$true] %s403_s16 }
  0x17   :  { %505 = vmatpush3.xpose.msk.msra.mxu0 %vm44_vm0, %v38_v7  ;;  %571 = vmatpush3.xpose.msk.msra.mxu1 %vm44_vm0, %v38_v7  ;;  %s649_s17 = scalar_lea.vmem %s404_s16, 2048  ;;  %p654_p1 = scmp.lt.s32.totalorder %s404_s16, %s404_s16 }
  0x18   :  { %506 = vmatprep.subr.msk.mxu0 %vm44_vm0, %v37_v8  ;;  %556 = vmatprep.subr.msk.mxu1 %vm44_vm0, %v37_v8  ;;  %p650_p0 = scmp.ne.s32.totalorder %s404_s16, %s649_s17  ;;  %p655_p2 = scmp.lt.s32.totalorder %s649_s17, %s649_s17 }
  0x1a   :  { %p656_p3 = por %p655_p2, %p654_p1 }
  0x1b   :  { %507 = vmatpush3.xpose.msk.msra.mxu0 %vm44_vm0, %v37_v8  ;;  %572 = vmatpush3.xpose.msk.msra.mxu1 %vm44_vm0, %v37_v8 }
  0x1c   :  { %508 = vmatprep.subr.msk.mxu0 %vm44_vm0, %v36_v9  ;;  %557 = vmatprep.subr.msk.mxu1 %vm44_vm0, %v36_v9  ;;  %p657_p4 = pnand %p656_p3, %p650_p0 }
  0x1f   :  { %509 = vmatpush3.xpose.msk.msra.mxu0 %vm44_vm0, %v36_v9  ;;  %573 = vmatpush3.xpose.msk.msra.mxu1 %vm44_vm0, %v36_v9 }
  0x20   :  { %510 = vmatprep.subr.msk.mxu0 %vm44_vm0, %v35_v10  ;;  %558 = vmatprep.subr.msk.mxu1 %vm44_vm0, %v35_v10 }
  0x23   :  { %511 = vmatpush3.xpose.msk.msra.mxu0 %vm44_vm0, %v35_v10  ;;  %574 = vmatpush3.xpose.msk.msra.mxu1 %vm44_vm0, %v35_v10 }
  0x24   :  { %512 = vmatprep.subr.msk.mxu0 %vm44_vm0, %v34_v11  ;;  %559 = vmatprep.subr.msk.mxu1 %vm44_vm0, %v34_v11 }
  0x27   :  { %513 = vmatpush3.xpose.msk.msra.mxu0 %vm44_vm0, %v34_v11  ;;  %575 = vmatpush3.xpose.msk.msra.mxu1 %vm44_vm0, %v34_v11 }
  0x28   :  { %514 = vmatprep.subr.msk.mxu0 %vm44_vm0, %v33_v12  ;;  %560 = vmatprep.subr.msk.mxu1 %vm44_vm0, %v33_v12 }
  0x2b   :  { %515 = vmatpush3.xpose.msk.msra.mxu0 %vm44_vm0, %v33_v12  ;;  %576 = vmatpush3.xpose.msk.msra.mxu1 %vm44_vm0, %v33_v12 }
  0x2c   :  { %516 = vmatprep.subr.msk.mxu0 %vm44_vm0, %v32_v13  ;;  %561 = vmatprep.subr.msk.mxu1 %vm44_vm0, %v32_v13 }
  0x2f   :  { %517 = vmatpush3.xpose.msk.msra.mxu0 %vm44_vm0, %v32_v13  ;;  %577 = vmatpush3.xpose.msk.msra.mxu1 %vm44_vm0, %v32_v13 }
  0x30   :  { %518 = vmatprep.subr.msk.mxu0 %vm44_vm0, %v31_v14  ;;  %562 = vmatprep.subr.msk.mxu1 %vm44_vm0, %v31_v14 }
  0x33   :  { %519 = vmatpush3.xpose.msk.msra.mxu0 %vm44_vm0, %v31_v14  ;;  %578 = vmatpush3.xpose.msk.msra.mxu1 %vm44_vm0, %v31_v14 }
  0x34   :  { %520 = vmatprep.subr.msk.mxu0 %vm44_vm0, %v30_v15  ;;  %563 = vmatprep.subr.msk.mxu1 %vm44_vm0, %v30_v15 }
  0x37   :  { %521 = vmatpush3.xpose.msk.msra.mxu0 %vm44_vm0, %v30_v15  ;;  %579 = vmatpush3.xpose.msk.msra.mxu1 %vm44_vm0, %v30_v15 }
  0x38   :  { %522 = vmatprep.subr.msk.mxu0 %vm44_vm0, %v29_v16  ;;  %564 = vmatprep.subr.msk.mxu1 %vm44_vm0, %v29_v16 }
  0x3b   :  { %523 = vmatpush3.xpose.msk.msra.mxu0 %vm44_vm0, %v29_v16  ;;  %580 = vmatpush3.xpose.msk.msra.mxu1 %vm44_vm0, %v29_v16 }
  0x3c   :  { %524 = vmatprep.subr.msk.mxu0 %vm44_vm0, %v28_v17  ;;  %565 = vmatprep.subr.msk.mxu1 %vm44_vm0, %v28_v17 }
  0x3f   :  { %525 = vmatpush3.xpose.msk.msra.mxu0 %vm44_vm0, %v28_v17  ;;  %581 = vmatpush3.xpose.msk.msra.mxu1 %vm44_vm0, %v28_v17 }
  0x42   :  { %527 = vmatmul.mubr.msk.f32.vlgmr.msra.gmra.mxu0 %vm44_vm0, %v13_v18  ;;  %539 = vmatmul.mubr.msk.f32.vlgmr.msra.gmra.mxu1 %vm44_vm0, %v21_v19 }
  0x43   :  { %529 = vmatprep.mubr.msk.f32.mxu0 %vm44_vm0, %v14_v20  ;;  %541 = vmatprep.mubr.msk.f32.mxu1 %vm44_vm0, %v22_v21 }
  0x46   :  { %530 = vmatmul.mubr.msk.f32.gmra.mxu0 %vm44_vm0, %v15_v22  ;;  %542 = vmatmul.mubr.msk.f32.gmra.mxu1 %vm44_vm0, %v23_v23 }
  0x47   :  { %532 = vmatprep.mubr.msk.f32.mxu0 %vm44_vm0, %v16_v24  ;;  %544 = vmatprep.mubr.msk.f32.mxu1 %vm44_vm0, %v24_v25 }
  0x4a   :  { %533 = vmatmul.mubr.msk.f32.gmra.mxu0 %vm44_vm0, %v17_v26  ;;  %545 = vmatmul.mubr.msk.f32.gmra.mxu1 %vm44_vm0, %v25_v27 }
  0x4b   :  { %535 = vmatprep.mubr.msk.f32.mxu0 %vm44_vm0, %v18_v28  ;;  %547 = vmatprep.mubr.msk.f32.mxu1 %vm44_vm0, %v26_v29 }
  0x4e   :  { %536 = vmatmul.mubr.msk.f32.gmra.mxu0 %vm44_vm0, %v19_v30  ;;  %548 = vmatmul.mubr.msk.f32.gmra.mxu1 %vm44_vm0, %v27_v31 }
 0x102   :  { %v528_v32 = vpop.f32.mrf.mxu0  ;;  %v540_v33 = vpop.f32.mrf.mxu1 }
 0x103   :  { %v447_v34 = vmul.f32 -1.442695, %v528_v32  ;;  %v455_v35 = vmul.f32 -1.442695, %v540_v33 }
 0x104   :  { %v207_v36 = vpop.f32.mrf.mxu0  ;;  %v247_v37 = vpop.f32.mrf.mxu1 }
 0x105   :  { %585 = vpow2.f32 %v447_v34  ;;  %v446_v38 = vmul.f32 -1.442695, %v207_v36  ;;  %v454_v39 = vmul.f32 -1.442695, %v247_v37 }
 0x106   :  { %587 = vpow2.f32 %v455_v35  ;;  %v531_v40 = vpop.f32.mrf.mxu0  ;;  %v543_v41 = vpop.f32.mrf.mxu1 }
 0x107   :  { %589 = vpow2.f32 %v446_v38  ;;  %v449_v42 = vmul.f32 -1.442695, %v531_v40  ;;  %v457_v43 = vmul.f32 -1.442695, %v543_v41 }
 0x108   :  { %591 = vpow2.f32 %v454_v39  ;;  %v217_v44 = vpop.f32.mrf.mxu0  ;;  %v257_v45 = vpop.f32.mrf.mxu1 }
 0x109   :  { %593 = vpow2.f32 %v449_v42  ;;  %v448_v46 = vmul.f32 -1.442695, %v217_v44  ;;  %v456_v47 = vmul.f32 -1.442695, %v257_v45 }
 0x10a   :  { %595 = vpow2.f32 %v457_v43  ;;  %v534_v48 = vpop.f32.mrf.mxu0  ;;  %v546_v49 = vpop.f32.mrf.mxu1 }
 0x10b   :  { %597 = vpow2.f32 %v448_v46  ;;  %v451_v50 = vmul.f32 -1.442695, %v534_v48  ;;  %v459_v51 = vmul.f32 -1.442695, %v546_v49 }
 0x10c   :  { %599 = vpow2.f32 %v456_v47  ;;  %v227_v52 = vpop.f32.mrf.mxu0  ;;  %v267_v53 = vpop.f32.mrf.mxu1 }
 0x10d   :  { %601 = vpow2.f32 %v451_v50  ;;  %v450_v54 = vmul.f32 -1.442695, %v227_v52  ;;  %v458_v55 = vmul.f32 -1.442695, %v267_v53 }
 0x10e   :  { %603 = vpow2.f32 %v459_v51  ;;  %v537_v56 = vpop.f32.mrf.mxu0  ;;  %v549_v57 = vpop.f32.mrf.mxu1 }
 0x10f   :  { %605 = vpow2.f32 %v450_v54  ;;  %v453_v58 = vmul.f32 -1.442695, %v537_v56  ;;  %v461_v59 = vmul.f32 -1.442695, %v549_v57 }
 0x110   :  { %607 = vpow2.f32 %v458_v55  ;;  %v237_v60 = vpop.f32.mrf.mxu0  ;;  %v277_v61 = vpop.f32.mrf.mxu1 }
 0x111   :  { %609 = vpow2.f32 %v453_v58  ;;  %v452_v62 = vmul.f32 -1.442695, %v237_v60  ;;  %v460_v63 = vmul.f32 -1.442695, %v277_v61 }
 0x112   :  { %v586_v0 = vpop.eup %585  ;;  %611 = vpow2.f32 %v461_v59 }
 0x113   :  { %v588_v1 = vpop.eup %587  ;;  %v335_v2 = vadd.f32 1.0, %v586_v0  ;;  %613 = vpow2.f32 %v452_v62 }
 0x114   :  { %v590_v3 = vpop.eup %589  ;;  %v343_v4 = vadd.f32 1.0, %v588_v1  ;;  %615 = vpow2.f32 %v460_v63 }
 0x115   :  { %v592_v5 = vpop.eup %591  ;;  %617 = vrcp.f32 %v335_v2  ;;  %v334_v6 = vadd.f32 1.0, %v590_v3 }
 0x116   :  { %v594_v7 = vpop.eup %593  ;;  %619 = vrcp.f32 %v343_v4  ;;  %v342_v8 = vadd.f32 1.0, %v592_v5 }
 0x117   :  { %v596_v9 = vpop.eup %595  ;;  %621 = vrcp.f32 %v334_v6  ;;  %v337_v10 = vadd.f32 1.0, %v594_v7 }
 0x118   :  { %v598_v11 = vpop.eup %597  ;;  %623 = vrcp.f32 %v342_v8  ;;  %v345_v12 = vadd.f32 1.0, %v596_v9 }
 0x119   :  { %v600_v13 = vpop.eup %599  ;;  %625 = vrcp.f32 %v337_v10  ;;  %v336_v14 = vadd.f32 1.0, %v598_v11 }
 0x11a   :  { %v602_v15 = vpop.eup %601  ;;  %627 = vrcp.f32 %v345_v12  ;;  %v344_v16 = vadd.f32 1.0, %v600_v13 }
 0x11b   :  { %v604_v17 = vpop.eup %603  ;;  %629 = vrcp.f32 %v336_v14  ;;  %v339_v18 = vadd.f32 1.0, %v602_v15 }
 0x11c   :  { %v606_v19 = vpop.eup %605  ;;  %631 = vrcp.f32 %v344_v16  ;;  %v347_v20 = vadd.f32 1.0, %v604_v17 }
 0x11d   :  { %v608_v21 = vpop.eup %607  ;;  %633 = vrcp.f32 %v339_v18  ;;  %v338_v22 = vadd.f32 1.0, %v606_v19 }
 0x11e   :  { %v610_v23 = vpop.eup %609  ;;  %635 = vrcp.f32 %v347_v20  ;;  %v346_v24 = vadd.f32 1.0, %v608_v21 }
 0x11f   :  { %v612_v25 = vpop.eup %611  ;;  %637 = vrcp.f32 %v338_v22  ;;  %v341_v26 = vadd.f32 1.0, %v610_v23 }
 0x120   :  { %v614_v27 = vpop.eup %613  ;;  %639 = vrcp.f32 %v346_v24  ;;  %v349_v28 = vadd.f32 1.0, %v612_v25 }
 0x121   :  { %v616_v29 = vpop.eup %615  ;;  %641 = vrcp.f32 %v341_v26  ;;  %v340_v30 = vadd.f32 1.0, %v614_v27 }
 0x122   :  { %v618_v31 = vpop.eup %617  ;;  %643 = vrcp.f32 %v349_v28  ;;  %v348_v32 = vadd.f32 1.0, %v616_v29 }
 0x123   :  { %v620_v33 = vpop.eup %619  ;;  %383 = vst [vmem:[#allocation2 + $0x8] sm:$0xff] %v618_v31  ;;  %645 = vrcp.f32 %v340_v30 }
 0x124   :  { %v622_v34 = vpop.eup %621  ;;  %391 = vst [vmem:[#allocation2 + $0x48] sm:$0xff] %v620_v33  ;;  %647 = vrcp.f32 %v348_v32 }
 0x125   :  { %v624_v35 = vpop.eup %623  ;;  %382 = vst [vmem:[#allocation2] sm:$0xff] %v622_v34 }
 0x126   :  { %v626_v36 = vpop.eup %625  ;;  %390 = vst [vmem:[#allocation2 + $0x40] sm:$0xff] %v624_v35 }
 0x127   :  { %v628_v37 = vpop.eup %627  ;;  %385 = vst [vmem:[#allocation2 + $0x18] sm:$0xff] %v626_v36 }
 0x128   :  { %v630_v38 = vpop.eup %629  ;;  %393 = vst [vmem:[#allocation2 + $0x58] sm:$0xff] %v628_v37 }
 0x129   :  { %v632_v39 = vpop.eup %631  ;;  %384 = vst [vmem:[#allocation2 + $0x10] sm:$0xff] %v630_v38 }
 0x12a   :  { %v634_v40 = vpop.eup %633  ;;  %392 = vst [vmem:[#allocation2 + $0x50] sm:$0xff] %v632_v39 }
 0x12b   :  { %v636_v41 = vpop.eup %635  ;;  %387 = vst [vmem:[#allocation2 + $0x28] sm:$0xff] %v634_v40 }
 0x12c   :  { %v638_v42 = vpop.eup %637  ;;  %395 = vst [vmem:[#allocation2 + $0x68] sm:$0xff] %v636_v41 }
 0x12d   :  { %v640_v43 = vpop.eup %639  ;;  %386 = vst [vmem:[#allocation2 + $0x20] sm:$0xff] %v638_v42 }
 0x12e   :  { %v642_v44 = vpop.eup %641  ;;  %394 = vst [vmem:[#allocation2 + $0x60] sm:$0xff] %v640_v43 }
 0x12f   :  { %v644_v45 = vpop.eup %643  ;;  %389 = vst [vmem:[#allocation2 + $0x38] sm:$0xff] %v642_v44 }
 0x130   :  { %v646_v46 = vpop.eup %645  ;;  %397 = vst [vmem:[#allocation2 + $0x78] sm:$0xff] %v644_v45 }
 0x131   :  { %v648_v47 = vpop.eup %647  ;;  %388 = vst [vmem:[#allocation2 + $0x30] sm:$0xff] %v646_v46 }
 0x132   :  { %396 = vst [vmem:[#allocation2 + $0x70] sm:$0xff] %v648_v47 }
 0x133   :  { %660 = shalt.err (!%p657_p4)
}
 0x134   :  { %s672_s18 = smov 128   ;;  %s673_s19 = smov 8  }
 0x135   :  { %409 = dma.vmem_to_hbm [thread:$0]  %s404_s16, 2048, %s870_s2, [#allocation3], %s672_s18, %s672_s18, %s673_s19  }
 0x136   :  { %669 = dma.done.wait [#allocation3], 2048  }
 0x137   :  { %670 = vsyncadd [#allocation3], 4294965248 }
 0x138   :  { %413 = vsyncpa [#allocation3], 1 }

</bundles_post_ra>
